<compile_context>
chip_gen: v5e
topology: v5e:2x2
jax: 0.10.0
libtpu: 0.0.40
codegen_flags: <defaults>
</compile_context>

<pallas_src>
import functools

import jax
import jax.numpy as jnp
from jax.experimental import pallas as pl
from jax.experimental.pallas import tpu as pltpu

LANES = 128  # lane width used to pad W3 for the MXU matmul (compute only)


def mlp_kernel(x_ref, w1_ref, b1_ref, w2_ref, b2_ref, w3_ref, b3_ref, o_ref,
               *, out_features):
    # One batch tile per grid step; weights/biases are VMEM-resident constants.
    x = x_ref[...].astype(jnp.bfloat16)                              # (TB, 11) cast in-kernel
    h1 = jnp.dot(x, w1_ref[...], preferred_element_type=jnp.float32) + b1_ref[...]
    h1 = jnp.maximum(h1, 0.0).astype(jnp.bfloat16)                   # (TB, 20)
    h2 = jnp.dot(h1, w2_ref[...], preferred_element_type=jnp.float32) + b2_ref[...]
    h2 = jnp.maximum(h2, 0.0).astype(jnp.bfloat16)                   # (TB, 20)
    out_full = jnp.dot(h2, w3_ref[...], preferred_element_type=jnp.float32)  # (TB, 128)
    # Store only the real output columns -> tiny contiguous HBM rows.
    o_ref[...] = out_full[:, :out_features] + b3_ref[...]            # (TB, out_features) f32


def _round_up(n, m):
    return ((n + m - 1) // m) * m


@functools.partial(jax.jit, static_argnames=("tile_b",))
def nn_forward(x, params, *, tile_b=2048):
    """Pallas forward pass equivalent to the PyTorch NN module."""
    w1, b1, w2, b2, w3, b3 = params
    B, in_features = x.shape
    out_features = w3.shape[1]

    # --- weight prep (tiny, done once per jit) -----------------------------
    w1_bf = w1.astype(jnp.bfloat16)
    w2_bf = w2.astype(jnp.bfloat16)
    # Pad layer-3 weight to 128 output lanes for the matmul only; the stored
    # output stays narrow (out_features columns).
    w3_p = jnp.zeros((w3.shape[0], LANES), jnp.bfloat16).at[:, :out_features].set(
        w3.astype(jnp.bfloat16))

    # --- batch tiling -------------------------------------------------------
    # >= 2 grid steps whenever B allows it (so v7x can use both TensorCores),
    # tile a multiple of 8 (sublane alignment).
    half = _round_up(-(-B // 2), 8)
    tb = max(8, min(_round_up(tile_b, 8), half))
    grid = (pl.cdiv(B, tb),)          # ragged last tile handled by Pallas masking

    resident = lambda shape: pl.BlockSpec(shape, lambda i: (0, 0))

    out = pl.pallas_call(
        functools.partial(mlp_kernel, out_features=out_features),
        out_shape=jax.ShapeDtypeStruct((B, out_features), jnp.float32),
        grid=grid,
        in_specs=[
            pl.BlockSpec((tb, in_features), lambda i: (i, 0)),   # x: tiled over batch (f32)
            resident(w1_bf.shape), resident(b1.shape),
            resident(w2_bf.shape), resident(b2.shape),
            resident(w3_p.shape),  resident(b3.shape),
        ],
        out_specs=pl.BlockSpec((tb, out_features), lambda i: (i, 0)),
        compiler_params=pltpu.CompilerParams(
            dimension_semantics=("parallel",)),
    )(x, w1_bf, b1, w2_bf, b2, w3_p, b3)

    return out


def init_params(key, input_features=11, layer1=20, layer2=20, out_features=2):
    """Deterministic init mirroring PyTorch nn.Linear defaults
    (U[-1/sqrt(fan_in), 1/sqrt(fan_in)]); weights stored as [in, out]."""
    def linear(key, fan_in, fan_out):
        kw, kb = jax.random.split(key)
        bound = 1.0 / jnp.sqrt(fan_in)
        w = jax.random.uniform(kw, (fan_in, fan_out), jnp.float32, -bound, bound)
        b = jax.random.uniform(kb, (1, fan_out), jnp.float32, -bound, bound)
        return w, b

    k1, k2, k3 = jax.random.split(key, 3)
    w1, b1 = linear(k1, input_features, layer1)
    w2, b2 = linear(k2, layer1, layer2)
    w3, b3 = linear(k3, layer2, out_features)
    return (w1, b1, w2, b2, w3, b3)


def reference_forward(x, params):
    """Plain-JAX reference using the same bf16-weight / f32-accumulate math.
    Note: bf16 inputs/weights are a deliberate precision trade-off vs. a
    strict f32 PyTorch forward (relative error up to ~1e-2)."""
    w1, b1, w2, b2, w3, b3 = params
    h = jnp.dot(x.astype(jnp.bfloat16), w1.astype(jnp.bfloat16),
                preferred_element_type=jnp.float32) + b1
    h = jnp.maximum(h, 0.0).astype(jnp.bfloat16)
    h = jnp.dot(h, w2.astype(jnp.bfloat16),
                preferred_element_type=jnp.float32) + b2
    h = jnp.maximum(h, 0.0).astype(jnp.bfloat16)
    return jnp.dot(h, w3.astype(jnp.bfloat16),
                   preferred_element_type=jnp.float32) + b3


if __name__ == "__main__":
    key = jax.random.PRNGKey(0)
    kparams, kx1, kx2 = jax.random.split(key, 3)

    input_features = 11
    out_features = 2
    params = init_params(kparams, input_features=input_features,
                         out_features=out_features)

    # Small-batch check (single grid step).
    batch = 8
    x = jax.random.normal(kx1, (batch, input_features), jnp.float32)
    out = jax.block_until_ready(nn_forward(x, params))
    ref = reference_forward(x, params)
    assert out.shape == (batch, out_features)
    assert jnp.allclose(out, ref, atol=1e-2, rtol=1e-2)

    # Non-multiple batch with a multi-step grid (exercises ragged masking +
    # the two-TensorCore split on v7x).
    batch2 = 300
    x2 = jax.random.normal(kx2, (batch2, input_features), jnp.float32)
    out2 = jax.block_until_ready(nn_forward(x2, params))
    ref2 = reference_forward(x2, params)
    assert out2.shape == (batch2, out_features)
    assert jnp.allclose(out2, ref2, atol=1e-2, rtol=1e-2)

    print("KERNEL_OK")
</pallas_src>

<mosaic_0001>
module attributes {stable_mosaic.version = 11 : i64} {
  func.func @mlp_kernel(%arg0: i32, %arg1: memref<8x11xf32, #tpu.memory_space<vmem>>, %arg2: memref<11x20xbf16, #tpu.memory_space<vmem>>, %arg3: memref<1x20xf32, #tpu.memory_space<vmem>>, %arg4: memref<20x20xbf16, #tpu.memory_space<vmem>>, %arg5: memref<1x20xf32, #tpu.memory_space<vmem>>, %arg6: memref<20x128xbf16, #tpu.memory_space<vmem>>, %arg7: memref<1x2xf32, #tpu.memory_space<vmem>>, %arg8: memref<8x2xf32, #tpu.memory_space<vmem>>) attributes {dimension_semantics = [#tpu.dimension_semantics<parallel>], iteration_bounds = array<i64: 1>, scalar_prefetch = 0 : i64, scratch_operands = 0 : i64, tpu.core_type = #tpu.core_type<tc>, window_params = [{transform_indices = @transform_0, window_bounds = array<i64: 8, 11>}, {pipeline_mode = #tpu.pipeline_mode<synchronous>, transform_indices = @transform_1, window_bounds = array<i64: 11, 20>}, {pipeline_mode = #tpu.pipeline_mode<synchronous>, transform_indices = @transform_2, window_bounds = array<i64: 1, 20>}, {pipeline_mode = #tpu.pipeline_mode<synchronous>, transform_indices = @transform_3, window_bounds = array<i64: 20, 20>}, {pipeline_mode = #tpu.pipeline_mode<synchronous>, transform_indices = @transform_4, window_bounds = array<i64: 1, 20>}, {pipeline_mode = #tpu.pipeline_mode<synchronous>, transform_indices = @transform_5, window_bounds = array<i64: 20, 128>}, {pipeline_mode = #tpu.pipeline_mode<synchronous>, transform_indices = @transform_6, window_bounds = array<i64: 1, 2>}, {transform_indices = @transform_7, window_bounds = array<i64: 8, 2>}]} {
    %c0 = arith.constant 0 : index
    %c0_0 = arith.constant 0 : index
    %0 = vector.load %arg1[%c0, %c0_0] : memref<8x11xf32, #tpu.memory_space<vmem>>, vector<8x11xf32>
    %1 = arith.truncf %0 : vector<8x11xf32> to vector<8x11xbf16>
    %c0_1 = arith.constant 0 : index
    %c0_2 = arith.constant 0 : index
    %2 = vector.load %arg2[%c0_1, %c0_2] : memref<11x20xbf16, #tpu.memory_space<vmem>>, vector<11x20xbf16>
    %cst = arith.constant dense<0.000000e+00> : vector<8x20xf32>
    %3 = tpu.matmul %1, %2, %cst {dimension_numbers = #tpu.dot_dimension_numbers<[1], [0], [0], [1], [0, 0, 1, 1], [], []>} : vector<8x11xbf16>, vector<11x20xbf16>, vector<8x20xf32> -> vector<8x20xf32>
    %c0_3 = arith.constant 0 : index
    %c0_4 = arith.constant 0 : index
    %4 = vector.load %arg3[%c0_3, %c0_4] : memref<1x20xf32, #tpu.memory_space<vmem>>, vector<1x20xf32>
    %5 = vector.broadcast %4 : vector<1x20xf32> to vector<8x20xf32>
    %6 = arith.addf %3, %5 : vector<8x20xf32>
    %cst_5 = arith.constant 0.000000e+00 : f32
    %7 = vector.broadcast %cst_5 : f32 to vector<8x20xf32>
    %8 = arith.maximumf %6, %7 : vector<8x20xf32>
    %9 = arith.truncf %8 : vector<8x20xf32> to vector<8x20xbf16>
    %c0_6 = arith.constant 0 : index
    %c0_7 = arith.constant 0 : index
    %10 = vector.load %arg4[%c0_6, %c0_7] : memref<20x20xbf16, #tpu.memory_space<vmem>>, vector<20x20xbf16>
    %cst_8 = arith.constant dense<0.000000e+00> : vector<8x20xf32>
    %11 = tpu.matmul %9, %10, %cst_8 {dimension_numbers = #tpu.dot_dimension_numbers<[1], [0], [0], [1], [0, 0, 1, 1], [], []>} : vector<8x20xbf16>, vector<20x20xbf16>, vector<8x20xf32> -> vector<8x20xf32>
    %c0_9 = arith.constant 0 : index
    %c0_10 = arith.constant 0 : index
    %12 = vector.load %arg5[%c0_9, %c0_10] : memref<1x20xf32, #tpu.memory_space<vmem>>, vector<1x20xf32>
    %13 = vector.broadcast %12 : vector<1x20xf32> to vector<8x20xf32>
    %14 = arith.addf %11, %13 : vector<8x20xf32>
    %cst_11 = arith.constant 0.000000e+00 : f32
    %15 = vector.broadcast %cst_11 : f32 to vector<8x20xf32>
    %16 = arith.maximumf %14, %15 : vector<8x20xf32>
    %17 = arith.truncf %16 : vector<8x20xf32> to vector<8x20xbf16>
    %c0_12 = arith.constant 0 : index
    %c0_13 = arith.constant 0 : index
    %18 = vector.load %arg6[%c0_12, %c0_13] : memref<20x128xbf16, #tpu.memory_space<vmem>>, vector<20x128xbf16>
    %cst_14 = arith.constant dense<0.000000e+00> : vector<8x128xf32>
    %19 = tpu.matmul %17, %18, %cst_14 {dimension_numbers = #tpu.dot_dimension_numbers<[1], [0], [0], [1], [0, 0, 1, 1], [], []>} : vector<8x20xbf16>, vector<20x128xbf16>, vector<8x128xf32> -> vector<8x128xf32>
    %20 = vector.extract_strided_slice %19 {offsets = [0, 0], sizes = [8, 2], strides = [1, 1]} : vector<8x128xf32> to vector<8x2xf32>
    %c0_15 = arith.constant 0 : index
    %c0_16 = arith.constant 0 : index
    %21 = vector.load %arg7[%c0_15, %c0_16] : memref<1x2xf32, #tpu.memory_space<vmem>>, vector<1x2xf32>
    %22 = vector.broadcast %21 : vector<1x2xf32> to vector<8x2xf32>
    %23 = arith.addf %20, %22 : vector<8x2xf32>
    %c0_17 = arith.constant 0 : index
    %c0_18 = arith.constant 0 : index
    %24 = vector.load %arg8[%c0_17, %c0_18] : memref<8x2xf32, #tpu.memory_space<vmem>>, vector<8x2xf32>
    tpu.vector_store %arg8[%c0_17, %c0_18], %23 {strides = array<i32>} : memref<8x2xf32, #tpu.memory_space<vmem>>, vector<8x2xf32>,
    return
  }
  func.func @transform_0(%arg0: i32) -> (i32, i32) {
    %c0_i32 = arith.constant 0 : i32
    %c0_i32_0 = arith.constant 0 : i32
    return %arg0, %c0_i32 : i32, i32
  }
  func.func @transform_1(%arg0: i32) -> (i32, i32) {
    %c0_i32 = arith.constant 0 : i32
    %c0_i32_0 = arith.constant 0 : i32
    %c0_i32_1 = arith.constant 0 : i32
    return %c0_i32, %c0_i32_0 : i32, i32
  }
  func.func @transform_2(%arg0: i32) -> (i32, i32) {
    %c0_i32 = arith.constant 0 : i32
    %c0_i32_0 = arith.constant 0 : i32
    %c0_i32_1 = arith.constant 0 : i32
    return %c0_i32, %c0_i32_0 : i32, i32
  }
  func.func @transform_3(%arg0: i32) -> (i32, i32) {
    %c0_i32 = arith.constant 0 : i32
    %c0_i32_0 = arith.constant 0 : i32
    %c0_i32_1 = arith.constant 0 : i32
    return %c0_i32, %c0_i32_0 : i32, i32
  }
  func.func @transform_4(%arg0: i32) -> (i32, i32) {
    %c0_i32 = arith.constant 0 : i32
    %c0_i32_0 = arith.constant 0 : i32
    %c0_i32_1 = arith.constant 0 : i32
    return %c0_i32, %c0_i32_0 : i32, i32
  }
  func.func @transform_5(%arg0: i32) -> (i32, i32) {
    %c0_i32 = arith.constant 0 : i32
    %c0_i32_0 = arith.constant 0 : i32
    %c0_i32_1 = arith.constant 0 : i32
    return %c0_i32, %c0_i32_0 : i32, i32
  }
  func.func @transform_6(%arg0: i32) -> (i32, i32) {
    %c0_i32 = arith.constant 0 : i32
    %c0_i32_0 = arith.constant 0 : i32
    %c0_i32_1 = arith.constant 0 : i32
    return %c0_i32, %c0_i32_0 : i32, i32
  }
  func.func @transform_7(%arg0: i32) -> (i32, i32) {
    %c0_i32 = arith.constant 0 : i32
    %c0_i32_0 = arith.constant 0 : i32
    return %arg0, %c0_i32 : i32, i32
  }
}

</mosaic_0001>

<bundles_post_ra>
// kernel: nn_forward.1
= control target key start
LH: loop header
LB: loop body
LE: loop exit
PB: predicated region body
PF: predicated region fallthrough
CT: control target
= control target key end

     0   :  { %vm44_vm0 = vcmask 1044480   ;;  %vm45_vm1 = vcmask 1045504   ;;  %v169_v2 = vmov 65535   ;;  %vm40_vm2 = vcmask 89088   ;;  %s247_s1 = inlined_call_operand.vmem [shape: bf16[11,20], index: 1, kind: input, shape index: {}]   ;;  %s248_s0 = inlined_call_operand.vmem [shape: f32[8,11], index: 0, kind: input, shape index: {}]   ;;  %s249_s2 = inlined_call_operand.vmem [shape: f32[1,20], index: 2, kind: input, shape index: {}]   ;;  %s250_s4 = inlined_call_operand.vmem [shape: f32[1,20], index: 4, kind: input, shape index: {}]   ;;  %s251_s3 = inlined_call_operand.vmem [shape: bf16[20,20], index: 3, kind: input, shape index: {}]   ;;  %s252_s6 = inlined_call_operand.vmem [shape: f32[1,2], index: 6, kind: input, shape index: {}]   ;;  %s253_s5 = inlined_call_operand.vmem [shape: bf16[20,128], index: 5, kind: input, shape index: {}]   ;;  %s254_s7 = inlined_call_operand.vmem [shape: f32[8,2], index: 7, kind: output, shape index: {}]  }
   0x1   :  { %v149_v0 = vld [vmem:[%s247_s1] sm:$0xf]  ;;  %v162_v1 = vld [vmem:[%s247_s1] sm:$0x30]  ;;  %v46_v3 = vsel %vm44_vm0, 4294967295, %v169_v2  ;;  %vm86_vm3 = vcmask 1041408  }
   0x2   :  { %v150_v4 = vor.u32 %v162_v1, %v149_v0  ;;  %v47_v5 = vsel %vm45_vm1, %v46_v3, 0  ;;  %v27_v6 = vld [vmem:[%s248_s0] sm:$0xff]  ;;  %v68_v9 = vld [vmem:[%s251_s3 + $0x8] sm:$0x3]  ;;  %vm82_vm4 = vcmask 162816   ;;  %vm141_vm5 = vcmask 15360  }
   0x3   :  { %v28_v8 = vpack.c.bf16 %v27_v6, %v27_v6  ;;  %v78_v10 = vunpack.c.l.b16 %v68_v9  ;;  %v163_v13 = vld [vmem:[%s251_s3] sm:$0xff]  ;;  %v107_v20 = vld [vmem:[%s253_s5 + $0x8] sm:$0x3] }
   0x4   :  { %v49_v7 = vand.u32 %v150_v4, %v47_v5  ;;  %v166_v14 = vld [vmem:[%s249_s2] ss:$0 sm:$0xff]  ;;  %v113_v21 = vunpack.c.l.b16 %v107_v20 }
   0x5   :  { %v80_v11 = vpack.c.b16 %v78_v10, %v78_v10  ;;  %v164_v24 = vld [vmem:[%s253_s5] sm:$0xff] }
   0x6   :  { %58 = vmatpush.bf16.msra.mxu0 %v49_v7  ;;  %v115_v22 = vpack.c.b16 %v113_v21, %v113_v21  ;;  %v167_v25 = vld [vmem:[%s250_s4] ss:$0 sm:$0xff] }
   0x7   :  { %v88_v12 = vsel %vm86_vm3, %v80_v11, 0  ;;  %v168_v31 = vld [vmem:[%s252_s6] ss:$0 sm:$0xff] }
   0x8   :  { %96 = vmatpush.bf16.msra.mxu1 %v88_v12  ;;  %v121_v23 = vsel %vm86_vm3, %v115_v22, 0 }
   0x9   :  { %151 = vmatmul.msk.bf16.vlgmr.msra.gmra.mxu0 %vm40_vm2, %v28_v8  ;;  %129 = vmatpush.bf16.msra.mxu2 %v121_v23 }
   0xc   :  { %97 = vmatpush.bf16.msra.mxu1 %v163_v13 }
   0xd   :  { %130 = vmatpush.bf16.msra.mxu2 %v164_v24 }
  0x86   :  { %v60_v15 = vpop.f32.mrf.mxu0 }
  0x87   :  { %v61_v16 = vadd.f32 %v166_v14, %v60_v15 }
  0x89   :  { %v64_v17 = vmax.f32 %v61_v16, 0.0 }
  0x8b   :  { %v65_v18 = vpack.c.bf16 %v64_v17, %v64_v17 }
  0x8d   :  { %156 = vmatmul.msk.bf16.vlgmr.msra.gmra.mxu1 %vm82_vm4, %v65_v18 }
  0x8e   :  { %v62_v19 = vpop.f32.mrf.mxu0 }
 0x10a   :  { %v99_v26 = vpop.f32.mrf.mxu1 }
 0x10b   :  { %v100_v27 = vadd.f32 %v167_v25, %v99_v26 }
 0x10d   :  { %v103_v28 = vmax.f32 %v100_v27, 0.0 }
 0x10f   :  { %v104_v29 = vpack.c.bf16 %v103_v28, %v103_v28 }
 0x111   :  { %161 = vmatmul.msk.bf16.vlgmr.msra.gmra.mxu2 %vm82_vm4, %v104_v29 }
 0x112   :  { %v101_v30 = vpop.f32.mrf.mxu1 }
 0x194   :  { %v132_v32 = vpop.f32.mrf.mxu2 }
 0x195   :  { %v140_v33 = vadd.f32 %v168_v31, %v132_v32 }
 0x197   :  { %142 = vst.msk [vmem:[%s254_s7] sm:$0xff] %vm141_vm5, %v140_v33 }
 0x19c   :  { %v134_v34 = vpop.f32.mrf.mxu2 }

</bundles_post_ra>
